<compile_context>
chip_gen: v6e
topology: v6e:2x2x1
jax: 0.10.0
libtpu: 0.0.40
codegen_flags: <defaults>
</compile_context>

<pallas_src>
import functools

import jax
import jax.numpy as jnp
from jax.experimental import pallas as pl
from jax.experimental.pallas import tpu as pltpu

_LANE = 128


def _round_up(n: int, m: int) -> int:
    return ((n + m - 1) // m) * m


@functools.lru_cache(maxsize=None)
def _vmem_capacity_bytes() -> int:
    try:
        return int(pltpu.get_tpu_info().vmem_capacity_bytes)
    except Exception:
        return 64 << 20  # conservative fallback: v7x per-TensorCore VMEM


def _big_vmem() -> bool:
    # v5e / v6e have 128 MiB VMEM per TensorCore; v7x only 64 MiB.
    return _vmem_capacity_bytes() >= (100 << 20)


def _tk_cap(dtype) -> int:
    return 1024 if jnp.dtype(dtype).itemsize >= 4 else 2048


def _sublane(dtype) -> int:
    size = jnp.dtype(dtype).itemsize
    return 8 if size >= 4 else (16 if size == 2 else 32)


def _pad_nk(N: int, K: int, compute_dtype):
    """Padded (Np, Kp) so output is lane-dense and tiles fill the 2x256 MXU."""
    Np = _round_up(N, 256) if N > _LANE else _LANE
    cap = _tk_cap(compute_dtype)
    if K <= cap:
        Kp = _round_up(K, 256) if K > _LANE else _LANE
    else:
        Kp = _round_up(K, cap)
    return Np, Kp


# --------------------------------------------------------------------------
# Kernels: one (tm, tn) output tile; K tiled along grid axis 2 (innermost,
# "arbitrary").  W is already transposed/padded to [Kp, Np], so the MXU sees a
# plain (tm,tk) @ (tk,tn) contraction with f32 accumulation.
# --------------------------------------------------------------------------
def _linear_kernel_f32out(x_ref, w_ref, b_ref, o_ref):
    """f32 output: accumulate directly into the resident output tile."""
    k = pl.program_id(2)

    @pl.when(k == 0)
    def _():
        o_ref[...] = jnp.zeros_like(o_ref)

    o_ref[...] += jnp.dot(x_ref[...], w_ref[...],
                          preferred_element_type=jnp.float32)

    @pl.when(k == pl.num_programs(2) - 1)
    def _():
        o_ref[...] += b_ref[...].astype(jnp.float32)


def _linear_kernel_scratch(x_ref, w_ref, b_ref, o_ref, acc_ref):
    """Generic output dtype: f32 VMEM accumulator, bias + cast on last K step."""
    k = pl.program_id(2)

    @pl.when(k == 0)
    def _():
        acc_ref[...] = jnp.zeros_like(acc_ref)

    acc_ref[...] += jnp.dot(x_ref[...], w_ref[...],
                            preferred_element_type=jnp.float32)

    @pl.when(k == pl.num_programs(2) - 1)
    def _():
        o_ref[...] = (acc_ref[...] + b_ref[...].astype(jnp.float32)).astype(
            o_ref.dtype
        )


# --------------------------------------------------------------------------
# One-time parameter preparation (hoisted out of the per-call path).
# --------------------------------------------------------------------------
def prepare_linear_params(weight: jax.Array, bias: jax.Array,
                          compute_dtype=jnp.bfloat16):
    """Transpose W to [K, N], cast to the MXU compute dtype, pad to [Kp, Np];
    bias -> f32 [1, Np].  Weights are static across calls, so this cost is
    amortized to ~zero."""
    fan_out, fan_in = weight.shape
    Np, Kp = _pad_nk(fan_out, fan_in, compute_dtype)

    w_t = jnp.asarray(weight).T.astype(compute_dtype)  # [K, N]
    if (Kp, Np) != (fan_in, fan_out):
        w_p = jnp.zeros((Kp, Np), compute_dtype).at[:fan_in, :fan_out].set(w_t)
    else:
        w_p = w_t

    b = jnp.asarray(bias).astype(jnp.float32).reshape(1, fan_out)
    b_p = (jnp.zeros((1, Np), jnp.float32).at[:, :fan_out].set(b)
           if Np != fan_out else b)
    return w_p, b_p


# --------------------------------------------------------------------------
# Forward pass.
# --------------------------------------------------------------------------
@functools.partial(jax.jit, static_argnames=("fan_out",))
def linear_map(x: jax.Array, w_p: jax.Array, b_p: jax.Array, *, fan_out: int):
    """y = x @ W.T + b (nn.Linear semantics).

    x:    [..., fan_in]  any float dtype; cast to w_p.dtype for the MXU.
    w_p:  [Kp, Np]       pre-transposed, padded weight (prepare_linear_params).
    b_p:  [1, Np]        padded f32 bias.
    """
    cdtype = w_p.dtype
    csize = jnp.dtype(cdtype).itemsize
    Kp, Np = w_p.shape
    out_dtype = x.dtype
    osize = jnp.dtype(out_dtype).itemsize

    orig_shape = x.shape
    K = orig_shape[-1]
    assert K <= Kp and fan_out <= Np, "params not prepared for this shape"
    x2 = x.reshape(-1, K)
    M = x2.shape[0]

    # ---- tile selection (generation-aware) -------------------------------
    big = _big_vmem()  # 128 MiB VMEM (v5e/v6e) vs 64 MiB (v7x)
    cap = _tk_cap(cdtype)
    tk = Kp if Kp <= cap else cap
    assert Kp % tk == 0, "w_p must come from prepare_linear_params"

    tn_max = 1024 if big else 512
    tn = _LANE
    for cand in (1024, 512, 256, 128):
        if cand <= tn_max and Np % cand == 0:
            tn = cand
            break

    sub = _sublane(cdtype)
    tm_max = 1024 if big else 512
    if M <= tm_max:
        tm = _round_up(M, sub)
        Mp = tm
    else:
        tm = tm_max
        Mp = _round_up(M, tm)

    # v7x has 2 TensorCores sharding the "parallel" axes: avoid a grid with a
    # single output tile when we can split it in N.
    if Mp // tm == 1 and Np // tn == 1 and tn > _LANE:
        tn //= 2

    # ---- per-call data movement: pad + cast x only ------------------------
    if (Mp, Kp) != (M, K):
        x_p = jnp.zeros((Mp, Kp), cdtype).at[:M, :K].set(x2.astype(cdtype))
    else:
        x_p = x2.astype(cdtype)

    grid = (Mp // tm, Np // tn, Kp // tk)

    use_direct = jnp.dtype(out_dtype) == jnp.dtype(jnp.float32)
    kernel = _linear_kernel_f32out if use_direct else _linear_kernel_scratch
    scratch = [] if use_direct else [pltpu.VMEM((tm, tn), jnp.float32)]

    # VMEM budget: double-buffered tiles (+ optional accumulator) + slack,
    # clamped to 3/4 of this generation's physical VMEM (v7x: 48 MiB).
    needed = (2 * (tm * tk + tk * tn) * csize + 2 * tm * tn * osize
              + 2 * 8 * tn * 4 + (0 if use_direct else tm * tn * 4)) + (4 << 20)
    vmem_limit = int(min(max(needed, 32 << 20), _vmem_capacity_bytes() * 3 // 4))

    # Honest HBM traffic estimate including re-streaming factors.
    flops = 2 * M * fan_out * K
    bytes_accessed = ((Np // tn) * Mp * Kp * csize      # x re-read per N tile
                      + (Mp // tm) * Np * Kp * csize    # W re-read per M tile
                      + Np * 4 + Mp * Np * osize)

    # TODO(synk): on v5e's small-M weight-streaming path, sweep
    # pipeline_mode=pl.Buffered(3) on the W BlockSpec (few-% win, VMEM cost).
    out_p = pl.pallas_call(
        kernel,
        out_shape=jax.ShapeDtypeStruct((Mp, Np), out_dtype),
        grid_spec=pltpu.PrefetchScalarGridSpec(
            num_scalar_prefetch=0,
            grid=grid,
            in_specs=[
                pl.BlockSpec((tm, tk), lambda i, j, k: (i, k)),   # x   [Mp, Kp]
                pl.BlockSpec((tk, tn), lambda i, j, k: (k, j)),   # W^T [Kp, Np]
                pl.BlockSpec((1, tn), lambda i, j, k: (0, j)),    # b   [1, Np]
            ],
            out_specs=pl.BlockSpec((tm, tn), lambda i, j, k: (i, j)),
            scratch_shapes=scratch,
        ),
        compiler_params=pltpu.CompilerParams(
            dimension_semantics=("parallel", "parallel", "arbitrary"),
            vmem_limit_bytes=vmem_limit,
        ),
        cost_estimate=pl.CostEstimate(
            flops=flops, transcendentals=0, bytes_accessed=bytes_accessed
        ),
    )(x_p, w_p, b_p)

    y = out_p[:M, :fan_out] if (Mp, Np) != (M, fan_out) else out_p
    return y.reshape(*orig_shape[:-1], fan_out)


# --------------------------------------------------------------------------
# Module-style wrapper + init matching nn.Linear defaults.
# --------------------------------------------------------------------------
def init_linear_params(key, fan_in: int, fan_out: int, dtype=jnp.float32):
    """nn.Linear default init: uniform(-1/sqrt(fan_in), +1/sqrt(fan_in))."""
    kw, kb = jax.random.split(key)
    bound = 1.0 / (fan_in ** 0.5)
    weight = jax.random.uniform(kw, (fan_out, fan_in), dtype, -bound, bound)
    bias = jax.random.uniform(kb, (fan_out,), dtype, -bound, bound)
    return weight, bias


class LinearMap:
    """JAX/Pallas equivalent of the PyTorch LinearMap module."""

    def __init__(self, fan_in: int = 1, fan_out: int = 1, *, key,
                 dtype=jnp.float32, compute_dtype=jnp.bfloat16):
        self.fan_in, self.fan_out = fan_in, fan_out
        self.weight, self.bias = init_linear_params(key, fan_in, fan_out, dtype)
        # Padding / transpose / compute-dtype cast hoisted to init time.
        self.w_p, self.b_p = prepare_linear_params(self.weight, self.bias,
                                                   compute_dtype)

    def __call__(self, x):
        return linear_map(x, self.w_p, self.b_p, fan_out=self.fan_out)


def _reference(x, weight, bias, compute_dtype):
    """Reference with the same input quantization, f32 accumulation."""
    xc = x.astype(compute_dtype).astype(jnp.float32)
    wc = weight.astype(compute_dtype).astype(jnp.float32)
    y = jnp.dot(xc.reshape(-1, x.shape[-1]), wc.T,
                precision=jax.lax.Precision.HIGHEST) + bias.astype(jnp.float32)
    return y.reshape(*x.shape[:-1], weight.shape[0]).astype(x.dtype)


if __name__ == "__main__":
    key = jax.random.PRNGKey(0)
    k1, k2, k3, k4, kp1, kp2, kp3, kp4 = jax.random.split(key, 8)

    # 1) Small module-consistent shape: [batch, seq, fan_in], bf16 MXU path.
    batch, seq, fan_in, fan_out = 2, 8, 32, 16
    x = jax.random.normal(k1, (batch, seq, fan_in), jnp.float32)
    layer = LinearMap(fan_in, fan_out, key=kp1)
    y = layer(x)
    jax.block_until_ready(y)
    assert y.shape == (batch, seq, fan_out)
    assert jnp.allclose(y, _reference(x, layer.weight, layer.bias, jnp.bfloat16),
                        atol=5e-3, rtol=5e-3)

    # 2) 2-D input, N padded 384->512, two N tiles (megacore split), bf16 path.
    M2, fi2, fo2 = 256, 1024, 384
    x2 = jax.random.normal(k2, (M2, fi2), jnp.float32)
    w2, b2 = init_linear_params(kp2, fi2, fo2)
    w2p, b2p = prepare_linear_params(w2, b2, jnp.bfloat16)
    y2 = linear_map(x2, w2p, b2p, fan_out=fo2)
    jax.block_until_ready(y2)
    assert y2.shape == (M2, fo2)
    assert jnp.allclose(y2, _reference(x2, w2, b2, jnp.bfloat16),
                        atol=5e-3, rtol=5e-3)

    # 3) Exact-f32 compute path (matches nn.Linear f32 semantics) with K-tiled
    #    accumulation (K=2048 > tk_cap) and direct-into-output accumulation.
    M3, fi3, fo3 = 192, 2048, 256
    x3 = jax.random.normal(k3, (M3, fi3), jnp.float32)
    w3, b3 = init_linear_params(kp3, fi3, fo3)
    w3p, b3p = prepare_linear_params(w3, b3, jnp.float32)
    y3 = linear_map(x3, w3p, b3p, fan_out=fo3)
    jax.block_until_ready(y3)
    assert jnp.allclose(y3, x3 @ w3.T + b3, atol=5e-4, rtol=5e-4)

    # 4) bf16 inputs/outputs -> scratch-accumulator kernel, multi-K-step.
    M4, fi4, fo4 = 64, 4096, 128
    x4 = jax.random.normal(k4, (M4, fi4), jnp.float32).astype(jnp.bfloat16)
    w4, b4 = init_linear_params(kp4, fi4, fo4, jnp.bfloat16)
    w4p, b4p = prepare_linear_params(w4, b4, jnp.bfloat16)
    y4 = linear_map(x4, w4p, b4p, fan_out=fo4)
    jax.block_until_ready(y4)
    y4_ref = _reference(x4, w4, b4, jnp.bfloat16)
    assert jnp.allclose(y4.astype(jnp.float32), y4_ref.astype(jnp.float32),
                        atol=2e-2, rtol=2e-2)

    print("KERNEL_OK")
</pallas_src>

<mosaic_0001>
module attributes {stable_mosaic.version = 11 : i64} {
  func.func @_linear_kernel_f32out(%arg0: i32, %arg1: i32, %arg2: i32, %arg3: memref<16x128xbf16, #tpu.memory_space<vmem>>, %arg4: memref<128x128xbf16, #tpu.memory_space<vmem>>, %arg5: memref<1x128xf32, #tpu.memory_space<vmem>>, %arg6: memref<16x128xf32, #tpu.memory_space<vmem>>) attributes {dimension_semantics = [#tpu.dimension_semantics<parallel>, #tpu.dimension_semantics<parallel>, #tpu.dimension_semantics<arbitrary>], iteration_bounds = array<i64: 1, 1, 1>, scalar_prefetch = 0 : i64, scratch_operands = 0 : i64, tpu.core_type = #tpu.core_type<tc>, window_params = [{transform_indices = @transform_0, window_bounds = array<i64: 16, 128>}, {transform_indices = @transform_1, window_bounds = array<i64: 128, 128>}, {transform_indices = @transform_2, window_bounds = array<i64: 1, 128>}, {transform_indices = @transform_3, window_bounds = array<i64: 16, 128>}]} {
    %c0_i32 = arith.constant 0 : i32
    %0 = arith.cmpi eq, %arg2, %c0_i32 : i32
    %1 = arith.extui %0 : i1 to i32
    %c0_i32_0 = arith.constant 0 : i32
    %2 = arith.cmpi ne, %1, %c0_i32_0 : i32
    scf.if %2 {
      %cst_10 = arith.constant 0.000000e+00 : f32
      %12 = vector.broadcast %cst_10 : f32 to vector<16x128xf32>
      %c0_11 = arith.constant 0 : index
      %c0_12 = arith.constant 0 : index
      %13 = vector.load %arg6[%c0_11, %c0_12] : memref<16x128xf32, #tpu.memory_space<vmem>>, vector<16x128xf32>
      tpu.vector_store %arg6[%c0_11, %c0_12], %12 {strides = array<i32>} : memref<16x128xf32, #tpu.memory_space<vmem>>, vector<16x128xf32>,
    } else {
    }
    %c0 = arith.constant 0 : index
    %c0_1 = arith.constant 0 : index
    %3 = vector.load %arg6[%c0, %c0_1] : memref<16x128xf32, #tpu.memory_space<vmem>>, vector<16x128xf32>
    %c0_2 = arith.constant 0 : index
    %c0_3 = arith.constant 0 : index
    %4 = vector.load %arg3[%c0_2, %c0_3] : memref<16x128xbf16, #tpu.memory_space<vmem>>, vector<16x128xbf16>
    %c0_4 = arith.constant 0 : index
    %c0_5 = arith.constant 0 : index
    %5 = vector.load %arg4[%c0_4, %c0_5] : memref<128x128xbf16, #tpu.memory_space<vmem>>, vector<128x128xbf16>
    %cst = arith.constant dense<0.000000e+00> : vector<16x128xf32>
    %6 = tpu.matmul %4, %5, %cst {dimension_numbers = #tpu.dot_dimension_numbers<[1], [0], [0], [1], [0, 0, 1, 1], [], []>} : vector<16x128xbf16>, vector<128x128xbf16>, vector<16x128xf32> -> vector<16x128xf32>
    %7 = arith.addf %3, %6 : vector<16x128xf32>
    %c0_6 = arith.constant 0 : index
    %c0_7 = arith.constant 0 : index
    %8 = vector.load %arg6[%c0_6, %c0_7] : memref<16x128xf32, #tpu.memory_space<vmem>>, vector<16x128xf32>
    tpu.vector_store %arg6[%c0_6, %c0_7], %7 {strides = array<i32>} : memref<16x128xf32, #tpu.memory_space<vmem>>, vector<16x128xf32>,
    %c0_i32_8 = arith.constant 0 : i32
    %9 = arith.cmpi eq, %arg2, %c0_i32_8 : i32
    %10 = arith.extui %9 : i1 to i32
    %c0_i32_9 = arith.constant 0 : i32
    %11 = arith.cmpi ne, %10, %c0_i32_9 : i32
    scf.if %11 {
      %c0_10 = arith.constant 0 : index
      %c0_11 = arith.constant 0 : index
      %12 = vector.load %arg6[%c0_10, %c0_11] : memref<16x128xf32, #tpu.memory_space<vmem>>, vector<16x128xf32>
      %c0_12 = arith.constant 0 : index
      %c0_13 = arith.constant 0 : index
      %13 = vector.load %arg5[%c0_12, %c0_13] : memref<1x128xf32, #tpu.memory_space<vmem>>, vector<1x128xf32>
      %14 = vector.broadcast %13 : vector<1x128xf32> to vector<16x128xf32>
      %15 = arith.addf %12, %14 : vector<16x128xf32>
      %c0_14 = arith.constant 0 : index
      %c0_15 = arith.constant 0 : index
      %16 = vector.load %arg6[%c0_14, %c0_15] : memref<16x128xf32, #tpu.memory_space<vmem>>, vector<16x128xf32>
      tpu.vector_store %arg6[%c0_14, %c0_15], %15 {strides = array<i32>} : memref<16x128xf32, #tpu.memory_space<vmem>>, vector<16x128xf32>,
    } else {
    }
    return
  }
  func.func @transform_0(%arg0: i32, %arg1: i32, %arg2: i32) -> (i32, i32) {
    %c0_i32 = arith.constant 0 : i32
    return %arg0, %arg2 : i32, i32
  }
  func.func @transform_1(%arg0: i32, %arg1: i32, %arg2: i32) -> (i32, i32) {
    %c0_i32 = arith.constant 0 : i32
    return %arg2, %arg1 : i32, i32
  }
  func.func @transform_2(%arg0: i32, %arg1: i32, %arg2: i32) -> (i32, i32) {
    %c0_i32 = arith.constant 0 : i32
    %c0_i32_0 = arith.constant 0 : i32
    return %c0_i32, %arg1 : i32, i32
  }
  func.func @transform_3(%arg0: i32, %arg1: i32, %arg2: i32) -> (i32, i32) {
    %c0_i32 = arith.constant 0 : i32
    return %arg0, %arg1 : i32, i32
  }
}

</mosaic_0001>

<bundles_post_ra>
// kernel: linear_map.1
= control target key start
LH: loop header
LB: loop body
LE: loop exit
PB: predicated region body
PF: predicated region fallthrough
CT: control target
= control target key end

     0   :  { %8 = vsyncpa [#allocation3], 0  ;;  %s250_s12 = smov [#allocation2]   ;;  %s290_s0 = inlined_call_operand.vmem [shape: bf16[16,128], index: 0, kind: input, shape index: {}]   ;;  %s291_s1 = inlined_call_operand.hbm [shape: bf16[128,128], index: 1, kind: input, shape index: {}]   ;;  %s292_s2 = inlined_call_operand.vmem [shape: f32[1,128], index: 2, kind: input, shape index: {}]   ;;  %s293_s3 = inlined_call_operand.vmem [shape: f32[16,128], index: 3, kind: output, shape index: {}]  }
   0x1   :  { %s16_s13 = sshll.u32 %s250_s12, 4  ;;  %s17_s13 = int_to_ptr.vmem [resolvable:$true] %s16_s13 }
   0x2   :  { %s236_s14 = scalar_lea.vmem %s17_s13, 1024  ;;  %p241_p1 = scmp.lt.s32.totalorder %s17_s13, %s17_s13 }
   0x3   :  { %p237_p0 = scmp.ne.s32.totalorder %s17_s13, %s236_s14  ;;  %p242_p2 = scmp.lt.s32.totalorder %s236_s14, %s236_s14 }
   0x5   :  { %p243_p3 = por %p242_p2, %p241_p1 }
   0x7   :  { %p244_p4 = pnand %p243_p3, %p237_p0 }
   0x9   :  { %247 = shalt.err (!%p244_p4)
}
   0xa   :  { %s251_s15 = smov 64   ;;  %s252_s16 = smov 4  }
   0xb   :  { %22 = dma.hbm_to_vmem [thread:$0]  %s291_s1, 1024, %s17_s13, [#allocation3], %s251_s15, %s251_s15, %s252_s16  }
   0xc   :  { %248 = dma.done.wait [#allocation3], 1024  }
   0xd   :  { %249 = vsyncadd [#allocation3], 4294966272  ;;  %v253_v0 = vmov 0.0   ;;  %vm254_vm0 = vmmov 0   ;;  %v219_v1 = vld [vmem:[#allocation2 + $0x38] sm:$0xff]   ;;  %v220_v2 = vld [vmem:[#allocation2 + $0x30] sm:$0xff]  }
   0xe   :  { %194 = vmatprep.subr.bf16.mxu0 %v253_v0  ;;  %210 = vmatprep.mubr.msk.bf16.mxu0 %vm254_vm0, %v253_v0  ;;  %v221_v3 = vld [vmem:[#allocation2 + $0x28] sm:$0xff]   ;;  %v222_v4 = vld [vmem:[#allocation2 + $0x20] sm:$0xff]   ;;  %v223_v5 = vld [vmem:[#allocation2 + $0x18] sm:$0xff]  }
   0xf   :  { %195 = vmatpush3.bf16.msra.mxu0 %v219_v1  ;;  %v224_v6 = vld [vmem:[#allocation2 + $0x10] sm:$0xff]   ;;  %v225_v7 = vld [vmem:[#allocation2 + $0x8] sm:$0xff]   ;;  %v226_v8 = vld [vmem:[#allocation2] sm:$0xff]  }
  0x10   :  { %196 = vmatprep.subr.bf16.mxu0 %v253_v0  ;;  %v227_v9 = vld [vmem:[%s290_s0] sm:$0xff]  }
  0x11   :  { %v184_v11 = vld [vmem:[%s292_s2] ss:$0 sm:$0xff] }
  0x13   :  { %197 = vmatpush3.bf16.msra.mxu0 %v220_v2 }
  0x14   :  { %198 = vmatprep.subr.bf16.mxu0 %v253_v0 }
  0x17   :  { %199 = vmatpush3.bf16.msra.mxu0 %v221_v3 }
  0x18   :  { %200 = vmatprep.subr.bf16.mxu0 %v253_v0 }
  0x1b   :  { %201 = vmatpush3.bf16.msra.mxu0 %v222_v4 }
  0x1c   :  { %202 = vmatprep.subr.bf16.mxu0 %v253_v0 }
  0x1f   :  { %203 = vmatpush3.bf16.msra.mxu0 %v223_v5 }
  0x20   :  { %204 = vmatprep.subr.bf16.mxu0 %v253_v0 }
  0x23   :  { %205 = vmatpush3.bf16.msra.mxu0 %v224_v6 }
  0x24   :  { %206 = vmatprep.subr.bf16.mxu0 %v253_v0 }
  0x27   :  { %207 = vmatpush3.bf16.msra.mxu0 %v225_v7 }
  0x28   :  { %208 = vmatprep.subr.bf16.mxu0 %v253_v0 }
  0x2b   :  { %209 = vmatpush3.bf16.msra.mxu0 %v226_v8 }
  0x2e   :  { %211 = vmatmul.mubr.bf16.vlgmr.msra.gmra.mxu0 %v227_v9 }
  0xee   :  { %v143_v10 = vpop.f32.mrf.mxu0 }
  0xef   :  { %v166_v13 = vadd.f32 %v184_v11, %v143_v10 }
  0xf0   :  { %v212_v12 = vpop.f32.mrf.mxu0 }
  0xf1   :  { %168 = vst [vmem:[%s293_s3] sm:$0xff] %v166_v13 }
  0xf2   :  { %v146_v14 = vpop.f32.mrf.mxu0 }
  0xf3   :  { %v167_v16 = vadd.f32 %v184_v11, %v146_v14 }
  0xf4   :  { %v213_v15 = vpop.f32.mrf.mxu0 }
  0xf5   :  { %169 = vst [vmem:[%s293_s3 + $0x8] sm:$0xff] %v167_v16 }
  0xf6   :  { %174 = vsyncpa [#allocation3], 1 }

</bundles_post_ra>
